<compile_context>
chip_gen: v5e
topology: v5e:2x2
jax: 0.10.0
libtpu: 0.0.40
codegen_flags: <defaults>
</compile_context>

<pallas_src>
import numpy as np
import jax
import jax.numpy as jnp
from jax.experimental import pallas as pl
from jax.experimental.pallas import tpu as pltpu

_LANES = 128
_FAR = 1.0e6   # coordinate used for non-visible keypoints -> Gaussian underflows to 0


# --------------------------------------------------------------------------- #
# Host-side precompute (static shapes)
# --------------------------------------------------------------------------- #
def _build_pixel_grids(scale_factors, image_out_size):
    """Concatenated (over scales) padded pixel axis P.

    Returns (grids (3, P) f32, per-scale (H, W, offset) metadata, P) where
      grids[0] = row * scale, grids[1] = col * scale, grids[2] = 1 / scale**2
    so that d2_at_scale = ((row*s - y)^2 + (col*s - x)^2) / s^2, bit-identical to
    (row - y/s)^2 + (col - x/s)^2 for power-of-two scale factors.
    """
    rows, cols, invs, meta = [], [], [], []
    off = 0
    for sf in scale_factors:
        H = image_out_size[0] // sf
        W = image_out_size[1] // sf
        n = H * W
        n_pad = pl.cdiv(n, _LANES) * _LANES
        lin = np.arange(n_pad, dtype=np.int64)
        rows.append((lin // W).astype(np.float32) * np.float32(sf))
        cols.append((lin % W).astype(np.float32) * np.float32(sf))
        invs.append(np.full(n_pad, 1.0 / float(sf * sf), np.float32))
        meta.append((H, W, off))
        off += n_pad
    grids = np.stack(
        [np.concatenate(rows), np.concatenate(cols), np.concatenate(invs)], axis=0)
    return jnp.asarray(grids), tuple(meta), off


def _pick_batch_block(batch):
    """Largest divisor of `batch` <= 8, keeping >= 2 grid steps when batch >= 2
    so the (parallel) batch axis can shard across v7x's two TensorCores."""
    cap = 1 if batch < 2 else max(1, min(8, batch // 2))
    for d in range(cap, 0, -1):
        if batch % d == 0:
            return d
    return 1


# --------------------------------------------------------------------------- #
# Pallas kernel
# --------------------------------------------------------------------------- #
def _make_kernel(dot_sd, dot_weight_sd, dot_weight):
    neg_inv2_sd = -1.0 / (2.0 * float(dot_sd) * float(dot_sd))
    neg_inv2_wsd = -1.0 / (2.0 * float(dot_weight_sd) * float(dot_weight_sd))
    wmul = float(dot_weight - 1)

    def kernel(grids_ref, kp_ref, hm_ref, wt_ref):
        # grids_ref : VMEM (3, P) f32  -- resident across grid steps (constant index_map)
        # kp_ref    : VMEM (B_blk, 3, K, 1) f32 -- rows: y, x, weight-addend
        # hm_ref/wt_ref : VMEM (B_blk, K, P) uint8
        g = grids_ref[...]                 # (3, P)
        rg = g[0:1, :]                     # (1, P)  row * scale
        cg = g[1:2, :]                     # (1, P)  col * scale
        i2 = g[2:3, :]                     # (1, P)  1 / scale^2

        kp = kp_ref[...]                   # (B_blk, 3, K, 1)
        y = kp[:, 0]                       # (B_blk, K, 1) -- lane-broadcasts over P
        x = kp[:, 1]
        wadd = kp[:, 2]                    # 1.0 for visible/'off', 0.0 for missing

        dy = rg - y                        # (B_blk, K, P)
        dx = cg - x
        d2 = (dy * dy + dx * dx) * i2

        # torch: (gauss * mul).to(uint8) truncates; values >= 0 so trunc == floor.
        hm = (jnp.exp(d2 * neg_inv2_sd) * 255.0).astype(jnp.int32)
        wt = (jnp.exp(d2 * neg_inv2_wsd) * wmul).astype(jnp.int32) + wadd.astype(jnp.int32)

        hm_ref[...] = hm.astype(jnp.uint8)
        wt_ref[...] = wt.astype(jnp.uint8)

    return kernel


def _render_heatmaps_fused(coords, flags, scale_factors, image_out_size,
                           dot_sd, dot_weight_sd, dot_weight, batch_block=None):
    """One pallas_call rendering heatmaps/weights for every scale factor."""
    B, K, _ = coords.shape
    grids, meta, P = _build_pixel_grids(scale_factors, image_out_size)

    # Branch-free flag encoding:
    #   visible (2): real coords, weight addend 1
    #   off     (1): far coords (gauss -> 0), addend 1  -> hm 0, wt 1
    #   missing (0): far coords,              addend 0  -> hm 0, wt 0
    vis = flags == 2
    y_enc = jnp.where(vis, coords[..., 0], jnp.float32(_FAR))
    x_enc = jnp.where(vis, coords[..., 1], jnp.float32(_FAR))
    wadd = jnp.where(flags == 0, 0.0, 1.0).astype(jnp.float32)
    kp_info = jnp.stack([y_enc, x_enc, wadd], axis=1)[..., None]   # (B, 3, K, 1)

    if batch_block is None:
        batch_block = _pick_batch_block(B)
    grid = (B // batch_block,)

    kernel = _make_kernel(dot_sd, dot_weight_sd, dot_weight)
    out_struct = jax.ShapeDtypeStruct((B, K, P), jnp.uint8)

    hm_flat, wt_flat = pl.pallas_call(
        kernel,
        grid=grid,
        in_specs=[
            pl.BlockSpec((3, P), lambda i: (0, 0)),                        # resident
            pl.BlockSpec((batch_block, 3, K, 1), lambda i: (i, 0, 0, 0)),
        ],
        out_specs=[
            pl.BlockSpec((batch_block, K, P), lambda i: (i, 0, 0)),
            pl.BlockSpec((batch_block, K, P), lambda i: (i, 0, 0)),
        ],
        out_shape=[out_struct, out_struct],
        compiler_params=pltpu.CompilerParams(
            dimension_semantics=("parallel",)),
    )(grids, kp_info)

    heatmaps, weights = [], []
    for (H, W, off) in meta:
        n = H * W
        heatmaps.append(hm_flat[:, :, off:off + n].reshape(B, K, H, W))
        weights.append(wt_flat[:, :, off:off + n].reshape(B, K, H, W))
    return heatmaps, weights


# --------------------------------------------------------------------------- #
# Coordinate transform glue (tiny, plain JAX)
# --------------------------------------------------------------------------- #
def _transform_coords(coords, h_shift, w_shift, tmat, image_in_size, image_out_size):
    """label shift + normalize + apply_matrix_to_coords + unnormalize.
    (division by heatmap_scale_factor happens inside the kernel via the grids)."""
    in_sz = jnp.asarray(image_in_size, jnp.float32)     # (H_in, W_in)
    out_sz = jnp.asarray(image_out_size, jnp.float32)   # (H_out, W_out)

    shift = jnp.stack([h_shift, w_shift], axis=-1)[:, None, :]   # (B, 1, 2)
    c = coords.astype(jnp.float32) + shift                       # (B, K, 2) (y, x)
    c = c * 2.0 / in_sz - 1.0                                    # normalize_coord
    A = tmat[:, :2, :2]
    t = tmat[:, :2, 2][:, None, :]
    c = jnp.einsum('bkj,bij->bki', c, A) + t                     # coord @ A^T + B
    c = (c + 1.0) * out_sz / 2.0                                 # unnormalize_coord
    return c


# --------------------------------------------------------------------------- #
# Pure-JAX reference (same math, used for validation in __main__)
# --------------------------------------------------------------------------- #
def _reference_render(coords, flags, scale_factors, image_out_size,
                      dot_sd, dot_weight_sd, dot_weight):
    hms, wts = [], []
    for sf in scale_factors:
        H = image_out_size[0] // sf
        W = image_out_size[1] // sf
        rg = jnp.arange(H, dtype=jnp.float32)[:, None] * float(sf)   # (H, 1)
        cg = jnp.arange(W, dtype=jnp.float32)[None, :] * float(sf)   # (1, W)
        y0 = coords[..., 0][..., None, None]                         # (B, K, 1, 1)
        x0 = coords[..., 1][..., None, None]
        d2 = ((rg - y0) ** 2 + (cg - x0) ** 2) * (1.0 / float(sf * sf))
        hm = (jnp.exp(-d2 / (2.0 * float(dot_sd) ** 2)) * 255.0).astype(jnp.int32)
        wt = (jnp.exp(-d2 / (2.0 * float(dot_weight_sd) ** 2))
              * float(dot_weight - 1)).astype(jnp.int32) + 1
        vis = (flags == 2)[..., None, None]
        off = (flags == 1)[..., None, None]
        hm = jnp.where(vis, hm, 0)
        wt = jnp.where(vis, wt, jnp.where(off, 1, 0))
        hms.append(hm.astype(jnp.uint8))
        wts.append(wt.astype(jnp.uint8))
    return hms, wts


# --------------------------------------------------------------------------- #
# Module wrapper
# --------------------------------------------------------------------------- #
class UnityMakeHeatmapsPallas:
    """JAX/Pallas port of UnityMakeHeatmaps.forward (dot keypoints)."""

    def __init__(self, keypoint_names, image_crop_size, image_out_size,
                 heatmap_scale_factors=(2, 4), dot_sd=4, curve_sd=2,
                 dot_weight_sd=40, curve_weight_sd=10, dot_weight=40,
                 curve_weight=10, sub_pixel=True):
        self.keypoint_names = keypoint_names
        self.image_crop_size = image_crop_size
        self.image_out_size = image_out_size
        self.heatmap_scale_factors = heatmap_scale_factors
        self.dot_sd = dot_sd
        self.dot_weight_sd = dot_weight_sd
        self.dot_weight = dot_weight
        # curve_sd / curve_weight_sd / curve_weight unused: see TODO(synk) above.

    def __call__(self, keypoint_coords, keypoint_flags, label_height_shift,
                 label_width_shift, transform_matrix):
        coords = _transform_coords(
            keypoint_coords, label_height_shift, label_width_shift,
            transform_matrix, self.image_crop_size, self.image_out_size)
        out_heatmaps, out_weights = _render_heatmaps_fused(
            coords, keypoint_flags, self.heatmap_scale_factors,
            self.image_out_size, self.dot_sd, self.dot_weight_sd, self.dot_weight)
        return out_heatmaps, out_weights   # lists of (B, K, H, W) uint8


# --------------------------------------------------------------------------- #
# Self-test
# --------------------------------------------------------------------------- #
if __name__ == "__main__":
    key = jax.random.PRNGKey(0)

    B = 2
    keypoint_names = ["kp_a", "kp_b", "kp_c", "kp_d"]
    K = len(keypoint_names)
    image_crop_size = (64, 64)
    image_out_size = (64, 64)
    scale_factors = (2, 4)

    # Deterministic "parsed label_data": (y, x) coords + flags.
    coords_rand = jax.random.uniform(
        key, (B, K, 2), jnp.float32, minval=8.0, maxval=56.0)
    # Pin one keypoint on an exact, scale-aligned pixel so its peak is exactly 255.
    keypoint_coords = coords_rand.at[0, 0].set(
        jnp.array([32.0, 32.0], dtype=jnp.float32))
    keypoint_flags = jnp.array([[2, 2, 1, 0],
                                [2, 1, 2, 2]], dtype=jnp.int32)

    # Identity transform + zero shifts (exact), so sub-pixel truncation matches ref.
    transform_matrix = jnp.broadcast_to(jnp.eye(3, dtype=jnp.float32), (B, 3, 3))
    label_height_shift = jnp.zeros((B,), jnp.float32)
    label_width_shift = jnp.zeros((B,), jnp.float32)

    module = UnityMakeHeatmapsPallas(
        keypoint_names=keypoint_names,
        image_crop_size=image_crop_size,
        image_out_size=image_out_size,
        heatmap_scale_factors=scale_factors,
        dot_sd=4, dot_weight_sd=40, dot_weight=40)

    out_heatmaps, out_weights = module(
        keypoint_coords, keypoint_flags,
        label_height_shift, label_width_shift, transform_matrix)

    for hm, wt in zip(out_heatmaps, out_weights):
        jax.block_until_ready(hm)
        jax.block_until_ready(wt)

    # Shapes / dtypes
    assert out_heatmaps[0].shape == (B, K, 32, 32) and out_heatmaps[0].dtype == jnp.uint8
    assert out_heatmaps[1].shape == (B, K, 16, 16) and out_heatmaps[1].dtype == jnp.uint8
    assert out_weights[0].shape == (B, K, 32, 32) and out_weights[0].dtype == jnp.uint8
    assert out_weights[1].shape == (B, K, 16, 16) and out_weights[1].dtype == jnp.uint8

    # Full-value comparison against a pure-JAX reference (tolerate 1 count for
    # exp ulp / rounding differences between the kernel and XLA paths).
    coords_t = _transform_coords(keypoint_coords, label_height_shift,
                                 label_width_shift, transform_matrix,
                                 image_crop_size, image_out_size)
    ref_hm, ref_wt = _reference_render(coords_t, keypoint_flags, scale_factors,
                                       image_out_size, 4, 40, 40)
    for hm, wt, rh, rw in zip(out_heatmaps, out_weights, ref_hm, ref_wt):
        dh = jnp.max(jnp.abs(hm.astype(jnp.int32) - rh.astype(jnp.int32)))
        dw = jnp.max(jnp.abs(wt.astype(jnp.int32) - rw.astype(jnp.int32)))
        assert int(dh) <= 1, f"heatmap mismatch: max |diff| = {int(dh)}"
        assert int(dw) <= 1, f"weight mismatch: max |diff| = {int(dw)}"

    # 'off' keypoint (flag==1) -> hm all zero, wt all one
    assert int(out_heatmaps[0][0, 2].max()) == 0
    assert int(out_weights[0][0, 2].min()) == 1 and int(out_weights[0][0, 2].max()) == 1
    # missing keypoint (flag==0) -> both all zero
    assert int(out_heatmaps[1][0, 3].max()) == 0 and int(out_weights[1][0, 3].max()) == 0
    # pinned visible keypoint lies exactly on a pixel at both scales -> peak 255
    assert int(out_heatmaps[0][0, 0].max()) == 255
    assert int(out_heatmaps[1][0, 0].max()) == 255
    # visible keypoint weight peaks at dot_weight
    assert int(out_weights[0][0, 0].max()) == 40

    print("KERNEL_OK")
</pallas_src>

<mosaic_0001>
module attributes {stable_mosaic.version = 11 : i64} {
  func.func @kernel(%arg0: i32, %arg1: memref<3x1280xf32, #tpu.memory_space<vmem>>, %arg2: memref<1x3x4x1xf32, #tpu.memory_space<vmem>>, %arg3: memref<1x4x1280xi8, #tpu.memory_space<vmem>>, %arg4: memref<1x4x1280xi8, #tpu.memory_space<vmem>>) attributes {dimension_semantics = [#tpu.dimension_semantics<parallel>], iteration_bounds = array<i64: 2>, scalar_prefetch = 0 : i64, scratch_operands = 0 : i64, tpu.core_type = #tpu.core_type<tc>, window_params = [{pipeline_mode = #tpu.pipeline_mode<synchronous>, transform_indices = @transform_0, window_bounds = array<i64: 3, 1280>}, {transform_indices = @transform_1, window_bounds = array<i64: 1, 3, 4, 1>}, {transform_indices = @transform_2, window_bounds = array<i64: 1, 4, 1280>}, {transform_indices = @transform_3, window_bounds = array<i64: 1, 4, 1280>}]} {
    %c0 = arith.constant 0 : index
    %c0_0 = arith.constant 0 : index
    %0 = vector.load %arg1[%c0, %c0_0] : memref<3x1280xf32, #tpu.memory_space<vmem>>, vector<3x1280xf32>
    %1 = vector.extract_strided_slice %0 {offsets = [0, 0], sizes = [1, 1280], strides = [1, 1]} : vector<3x1280xf32> to vector<1x1280xf32>
    %2 = vector.extract_strided_slice %0 {offsets = [1, 0], sizes = [1, 1280], strides = [1, 1]} : vector<3x1280xf32> to vector<1x1280xf32>
    %3 = vector.extract_strided_slice %0 {offsets = [2, 0], sizes = [1, 1280], strides = [1, 1]} : vector<3x1280xf32> to vector<1x1280xf32>
    %c0_1 = arith.constant 0 : index
    %c0_2 = arith.constant 0 : index
    %c0_3 = arith.constant 0 : index
    %c0_4 = arith.constant 0 : index
    %4 = vector.load %arg2[%c0_1, %c0_2, %c0_3, %c0_4] : memref<1x3x4x1xf32, #tpu.memory_space<vmem>>, vector<1x3x4x1xf32>
    %5 = vector.extract_strided_slice %4 {offsets = [0, 0, 0, 0], sizes = [1, 1, 4, 1], strides = [1, 1, 1, 1]} : vector<1x3x4x1xf32> to vector<1x1x4x1xf32>
    %6 = vector.shape_cast %5 : vector<1x1x4x1xf32> to vector<1x4x1xf32>
    %7 = vector.extract_strided_slice %4 {offsets = [0, 1, 0, 0], sizes = [1, 1, 4, 1], strides = [1, 1, 1, 1]} : vector<1x3x4x1xf32> to vector<1x1x4x1xf32>
    %8 = vector.shape_cast %7 : vector<1x1x4x1xf32> to vector<1x4x1xf32>
    %9 = vector.extract_strided_slice %4 {offsets = [0, 2, 0, 0], sizes = [1, 1, 4, 1], strides = [1, 1, 1, 1]} : vector<1x3x4x1xf32> to vector<1x1x4x1xf32>
    %10 = vector.shape_cast %9 : vector<1x1x4x1xf32> to vector<1x4x1xf32>
    %11 = vector.shape_cast %1 : vector<1x1280xf32> to vector<1x1x1280xf32>
    %12 = vector.broadcast %11 : vector<1x1x1280xf32> to vector<1x4x1280xf32>
    %13 = vector.broadcast %6 : vector<1x4x1xf32> to vector<1x4x1280xf32>
    %14 = arith.subf %12, %13 : vector<1x4x1280xf32>
    %15 = vector.shape_cast %2 : vector<1x1280xf32> to vector<1x1x1280xf32>
    %16 = vector.broadcast %15 : vector<1x1x1280xf32> to vector<1x4x1280xf32>
    %17 = vector.broadcast %8 : vector<1x4x1xf32> to vector<1x4x1280xf32>
    %18 = arith.subf %16, %17 : vector<1x4x1280xf32>
    %19 = arith.mulf %14, %14 : vector<1x4x1280xf32>
    %20 = arith.mulf %18, %18 : vector<1x4x1280xf32>
    %21 = arith.addf %19, %20 : vector<1x4x1280xf32>
    %22 = vector.shape_cast %3 : vector<1x1280xf32> to vector<1x1x1280xf32>
    %23 = vector.broadcast %22 : vector<1x1x1280xf32> to vector<1x4x1280xf32>
    %24 = arith.mulf %21, %23 : vector<1x4x1280xf32>
    %cst = arith.constant -3.125000e-02 : f32
    %25 = vector.broadcast %cst : f32 to vector<1x4x1280xf32>
    %26 = arith.mulf %24, %25 : vector<1x4x1280xf32>
    %27 = math.exp %26 : vector<1x4x1280xf32>
    %cst_5 = arith.constant 2.550000e+02 : f32
    %28 = vector.broadcast %cst_5 : f32 to vector<1x4x1280xf32>
    %29 = arith.mulf %27, %28 : vector<1x4x1280xf32>
    %30 = arith.fptosi %29 : vector<1x4x1280xf32> to vector<1x4x1280xi32>
    %cst_6 = arith.constant -3.125000e-04 : f32
    %31 = vector.broadcast %cst_6 : f32 to vector<1x4x1280xf32>
    %32 = arith.mulf %24, %31 : vector<1x4x1280xf32>
    %33 = math.exp %32 : vector<1x4x1280xf32>
    %cst_7 = arith.constant 3.900000e+01 : f32
    %34 = vector.broadcast %cst_7 : f32 to vector<1x4x1280xf32>
    %35 = arith.mulf %33, %34 : vector<1x4x1280xf32>
    %36 = arith.fptosi %35 : vector<1x4x1280xf32> to vector<1x4x1280xi32>
    %37 = arith.fptosi %10 : vector<1x4x1xf32> to vector<1x4x1xi32>
    %38 = vector.broadcast %37 : vector<1x4x1xi32> to vector<1x4x1280xi32>
    %39 = arith.addi %36, %38 : vector<1x4x1280xi32>
    %40 = arith.trunci %30 : vector<1x4x1280xi32> to vector<1x4x1280xi8>
    %c0_8 = arith.constant 0 : index
    %c0_9 = arith.constant 0 : index
    %c0_10 = arith.constant 0 : index
    %41 = vector.load %arg3[%c0_8, %c0_9, %c0_10] : memref<1x4x1280xi8, #tpu.memory_space<vmem>>, vector<1x4x1280xi8>
    tpu.vector_store %arg3[%c0_8, %c0_9, %c0_10], %40 {strides = array<i32>} : memref<1x4x1280xi8, #tpu.memory_space<vmem>>, vector<1x4x1280xi8>,
    %42 = arith.trunci %39 : vector<1x4x1280xi32> to vector<1x4x1280xi8>
    %c0_11 = arith.constant 0 : index
    %c0_12 = arith.constant 0 : index
    %c0_13 = arith.constant 0 : index
    %43 = vector.load %arg4[%c0_11, %c0_12, %c0_13] : memref<1x4x1280xi8, #tpu.memory_space<vmem>>, vector<1x4x1280xi8>
    tpu.vector_store %arg4[%c0_11, %c0_12, %c0_13], %42 {strides = array<i32>} : memref<1x4x1280xi8, #tpu.memory_space<vmem>>, vector<1x4x1280xi8>,
    return
  }
  func.func @transform_0(%arg0: i32) -> (i32, i32) {
    %c0_i32 = arith.constant 0 : i32
    %c0_i32_0 = arith.constant 0 : i32
    %c0_i32_1 = arith.constant 0 : i32
    return %c0_i32, %c0_i32_0 : i32, i32
  }
  func.func @transform_1(%arg0: i32) -> (i32, i32, i32, i32) {
    %c0_i32 = arith.constant 0 : i32
    %c0_i32_0 = arith.constant 0 : i32
    %c0_i32_1 = arith.constant 0 : i32
    %c0_i32_2 = arith.constant 0 : i32
    return %arg0, %c0_i32, %c0_i32_0, %c0_i32_1 : i32, i32, i32, i32
  }
  func.func @transform_2(%arg0: i32) -> (i32, i32, i32) {
    %c0_i32 = arith.constant 0 : i32
    %c0_i32_0 = arith.constant 0 : i32
    %c0_i32_1 = arith.constant 0 : i32
    return %arg0, %c0_i32, %c0_i32_0 : i32, i32, i32
  }
  func.func @transform_3(%arg0: i32) -> (i32, i32, i32) {
    %c0_i32 = arith.constant 0 : i32
    %c0_i32_0 = arith.constant 0 : i32
    %c0_i32_1 = arith.constant 0 : i32
    return %arg0, %c0_i32, %c0_i32_0 : i32, i32, i32
  }
}

</mosaic_0001>

<bundles_post_ra>
// kernel: tpu_custom_call.1
= control target key start
LH: loop header
LB: loop body
LE: loop exit
PB: predicated region body
PF: predicated region fallthrough
CT: control target
= control target key end

     0   :  { %9 = vsyncpa [#allocation3], 0  ;;  %s1301_s0 = inlined_call_operand.hbm [shape: f32[3,1280], index: 0, kind: input, shape index: {}]   ;;  %s1302_s1 = inlined_call_operand.vmem [shape: f32[2,3,4,1], index: 1, kind: input, shape index: {}]   ;;  %s1303_s2 = inlined_call_operand.hbm [shape: u8[2,4,1280], index: 2, kind: output, shape index: {0}]   ;;  %s1304_s3 = inlined_call_operand.hbm [shape: u8[2,4,1280], index: 3, kind: output, shape index: {1}]  }
   0x1   :  { %10 = vsyncpa [#allocation4], 0 }
   0x2   :  { %12 = vsyncpa [#allocation4 + $0x1], 0 }
   0x3   :  { %13 = vsyncpa [#allocation7], 0 }
   0x4   :  { %15 = vsyncpa [#allocation7 + $0x1], 0  ;;  %s1096_s12 = smov 0   ;;  %s1098_s13 = smov 0  }
   0x5   :  { %s1100_s14 = smov 0   ;;  %s1102_s15 = smov 0  }
   0x6 LB: > { %s1117_s16 = sadd.s32 4294967295, %s1072_s15   ;;  %s728_s17 = sadd.s32 4294967294, %s1072_s15   ;;  %s1072_s15 = sphi %s1102_s15, %s1310_s15   ;;  %s1068_s14 = sphi %s1100_s14, %s1309_s14   ;;  %s1064_s13 = sphi %s1098_s13, %s1308_s13   ;;  %s1060_s12 = sphi %s1096_s12, %s1307_s12  }
   0x7   : > { %s1121_s18 = sadd.s32 1, %s1072_s15   ;;  %s75_s19 = sadd.s32 1, %s1068_s14 }
   0x8   : > { %s72_s20 = ssub.s32 %s1072_s15, %s1121_s18  ;;  %p85_p0 = scmp.ne.s32.totalorder %s1068_s14, %s1064_s13 }
   0x9   : > { %p73_p1 = scmp.eq.s32.totalorder %s72_s20, 0  ;;  %p86_p2 = scmp.eq.s32.totalorder %s1117_s16, 1 }
   0xa   : > { %p91_p3 = scmp.ne.s32.totalorder %s1064_s13, %s1060_s12  ;;  %p92_p4 = scmp.eq.s32.totalorder %s728_s17, 1 }
   0xb   : > { %s1132_s21 = scalar_select %p73_p1, %s1068_s14, %s75_s19  }
   0xc   : > { %p1134_p5 = por %p86_p2, %p85_p0  ;;  %p1138_p6 = por %p92_p4, %p91_p3 }
   0xd   : > { %p729_p7 = scmp.ge.s32.totalorder %s1072_s15, 1  ;;  %p125_p8 = scmp.lt.s32.totalorder %s1072_s15, 3 }
   0xe   : > { %p865_p9 = scmp.eq.s32.totalorder %s1117_s16, 0  ;;  %s137_s26 = sshll.u32 %s1301_s0, 4  ;;  %s138_s26 = int_to_ptr.hbm [resolvable:$true] %s137_s26 }
   0xf   : > { %p126_p10 = pnand %p729_p7, %p125_p8  ;;  %s1074_s27 = smov [#allocation2]  }
  0x10   : > { %s139_s28 = sshll.u32 %s1074_s27, 4  ;;  %s140_s28 = int_to_ptr.vmem [resolvable:$true] %s139_s28 }
  0x11   : > { %p854_p11 = pneg %p126_p10  ;;  %160 = sbr.rel (%p126_p10) target bundleno = 240 (0xf0), region = 28 }
  0x13   : > { %p855_p12 = pnand %p865_p9, %p854_p11 }
  0x15   : > { %857 = dma.hbm_to_vmem [thread:$0]  (!%p855_p12), %s138_s26, 640, %s140_s28, [#allocation3]  }
  0x16   : > { %1047 = dma.done.wait (%p865_p9), [#allocation3], 640  }
  0x17   : > { %1049 = vsyncadd (%p865_p9), [#allocation3], 4294966656  ;;  %p190_p13 = scmp.lt.s32.totalorder %s1117_s16, 1  ;;  %v1075_v0 = vmov 0   ;;  %v195_v8 = vld [vmem:[#allocation2] sm:$0x77] }
  0x18   : > { %902 = vset.pattern.permute.xlu0 %v1075_v0  ;;  %903 = vset.pattern.permute.xlu1 %v1075_v0  ;;  %v196_v9 = vld [vmem:[#allocation2 + $0x8] sm:$0x77]  ;;  %v197_v10 = vld [vmem:[#allocation2 + $0x10] sm:$0x77]  ;;  %v1153_v11 = vld [vmem:[#allocation2 + $0x18] sm:$0x77] }
  0x19   : > { %s191_s29 = scalar_select %p190_p13, %s1117_s16, 1  ;;  %v1155_v12 = vld [vmem:[#allocation2 + $0x20] sm:$0x77]  ;;  %v208_v13 = vperm.slane %v195_v8, 0  ;;  %v209_v14 = vperm.slane %v195_v8, 4  ;;  %v210_v15 = vperm.slane %v196_v9, 0 }
  0x1a   : > { %v211_v16 = vperm.slane %v196_v9, 4  ;;  %v212_v17 = vperm.slane %v197_v10, 0  ;;  %v213_v18 = vperm.slane %v197_v10, 4  ;;  %v214_v19 = vperm.slane %v1153_v11, 0  ;;  %s1197_s7 = sand.u32 1, %s1064_s13   ;;  %s844_s8 = smul.u32 10, %s1117_s16 }
  0x1b   : > { %s738_s30 = smul.u32 12, %s191_s29  ;;  %v215_v20 = vperm.slane %v1153_v11, 4  ;;  %v216_v21 = vperm.slane %v1155_v12, 0  ;;  %v217_v22 = vperm.slane %v1155_v12, 4  ;;  %v228_v23 = vperm.slane %v208_v13, 0  ;;  %s590_s25 = scalar_lea.sflag [#allocation4], %s1197_s7 }
  0x1c   : > { %v229_v24 = vperm.slane %v209_v14, 0  ;;  %v230_v25 = vperm.slane %v210_v15, 0  ;;  %v231_v26 = vperm.slane %v211_v16, 0  ;;  %v253_v27 = vperm.slane %v195_v8, 1  ;;  %s737_s9 = smul.u32 10, %s1197_s7  ;;  %s605_s17 = scalar_lea.hbm %s1303_s2, %s844_s8 }
  0x1d   : > { %s194_s6 = scalar_lea.vmem %s1302_s1, %s738_s30  ;;  %v254_v28 = vperm.slane %v195_v8, 5  ;;  %v232_v29 = vperm.slane %v212_v17, 0  ;;  %v233_v30 = vperm.slane %v213_v18, 0  ;;  %v234_v31 = vperm.slane %v214_v19, 0  ;;  %s609_s24 = sshll.u32 %s605_s17, 4  ;;  %s610_s24 = int_to_ptr.hbm [resolvable:$true] %s609_s24 }
  0x1e   : > { %v200_v1 = vld [vmem:[%s194_s6] sm:$0xf]  ;;  %v202_v2 = vld [vmem:[%s194_s6 + $0x8] sm:$0xf]  ;;  %v201_v7 = vld [vmem:[%s194_s6 + $0x4] sm:$0xf] }
  0x1f   : > { %240 = vperm.xlu0 %902, %v200_v1   ;;  %vm839_vm0 = vcmp.lt.s32.totalorder %v202_v2, 0  ;;  %v840_v3 = vceil.f32 %v202_v2  ;;  %v841_v4 = vfloor.f32 %v202_v2  ;;  %v255_v32 = vperm.slane %v196_v9, 1  ;;  %s182_s19 = scalar_lea.vmem [#allocation5], %s737_s9  ;;  %s988_s26 = sshra.s32 %s610_s24, 4  ;;  %s989_s26 = int_to_ptr.hbm [resolvable:$true] %s988_s26 }
  0x20   : > { %v235_v33 = vperm.slane %v215_v20, 0  ;;  %v236_v34 = vperm.slane %v216_v21, 0  ;;  %v237_v35 = vperm.slane %v217_v22, 0  ;;  %v256_v36 = vperm.slane %v196_v9, 5  ;;  %s607_s20 = sshll.u32 %s182_s19, 4  ;;  %s990_s27 = scalar_lea.hbm %s989_s26, 10  ;;  %s608_s20 = int_to_ptr.vmem [resolvable:$true] %s607_s20 }
  0x21   : > { %v842_v5 = vsel %vm839_vm0, %v840_v3, %v841_v4  ;;  %v257_v37 = vperm.slane %v197_v10, 1  ;;  %v258_v38 = vperm.slane %v197_v10, 5  ;;  %v259_v39 = vperm.slane %v1153_v11, 1  ;;  %p991_p0 = scmp.ne.s32.totalorder %s989_s26, %s990_s27  ;;  %s994_s30 = scalar_lea.hbm %s1303_s2, 20 }
  0x22   : > { %v843_v6 = vcvt.f32.s32 %v842_v5  ;;  %v260_v40 = vperm.slane %v1153_v11, 5  ;;  %v261_v41 = vperm.slane %v1155_v12, 1  ;;  %v262_v42 = vperm.slane %v1155_v12, 5  ;;  %p995_p3 = scmp.lt.s32.totalorder %s989_s26, %s1303_s2  ;;  %p996_p4 = scmp.lt.s32.totalorder %s994_s30, %s990_s27 }
  0x23   : > { %v273_v43 = vperm.slane %v253_v27, 1  ;;  %v274_v44 = vperm.slane %v254_v28, 1  ;;  %v275_v46 = vperm.slane %v255_v32, 1  ;;  %v328_v47 = vperm.slane %v195_v8, 2  ;;  %p992_p1 = pnand %p991_p0, %p1134_p5 }
  0x24   : > { %470 = vperm.xlu1 %903, %v843_v6   ;;  %v329_v48 = vperm.slane %v195_v8, 6  ;;  %v330_v49 = vperm.slane %v196_v9, 2  ;;  %v331_v50 = vperm.slane %v196_v9, 6  ;;  %v332_v51 = vperm.slane %v197_v10, 2  ;;  %p997_p7 = por %p996_p4, %p995_p3 }
  0x25   : > { %v333_v52 = vperm.slane %v197_v10, 6  ;;  %v334_v53 = vperm.slane %v1153_v11, 2  ;;  %v276_v54 = vperm.slane %v256_v36, 1  ;;  %v277_v55 = vperm.slane %v257_v37, 1  ;;  %p993_p2 = pneg %p992_p1 }
  0x26   : > { %v278_v56 = vperm.slane %v258_v38, 1  ;;  %v279_v57 = vperm.slane %v259_v39, 1  ;;  %v280_v58 = vperm.slane %v260_v40, 1  ;;  %v281_v59 = vperm.slane %v261_v41, 1 }
  0x27   : > { %285 = vperm.xlu0 %902, %v201_v7   ;;  %v282_v60 = vperm.slane %v262_v42, 1  ;;  %v335_v61 = vperm.slane %v1153_v11, 6  ;;  %v348_v63 = vperm.slane %v328_v47, 2  ;;  %v349_v0 = vperm.slane %v329_v48, 2  ;;  %p998_p8 = pnand %p997_p7, %p993_p2 }
  0x28   : > { %v350_v1 = vperm.slane %v330_v49, 2  ;;  %v351_v2 = vperm.slane %v331_v50, 2  ;;  %v352_v3 = vperm.slane %v332_v51, 2  ;;  %v1167_v4 = vperm.slane %v333_v52, 2 }
  0x29   : > { %v1169_v5 = vperm.slane %v334_v53, 2  ;;  %v336_v8 = vperm.slane %v1155_v12, 2  ;;  %v337_v9 = vperm.slane %v1155_v12, 6  ;;  %vm510_vm9 = vcmask 1040384  }
  0x2a   : > { %vm514_vm10 = vcmask 1042434   ;;  %vm518_vm12 = vcmask 1041408   ;;  %vm520_vm14 = vcmask 1044484   ;;  %vm524_vm15 = vcmask 1046534  }
  0x2b   : > { %vm528_vm0 = vcmask 1045508  }
  0x91   : > { %v241_v45 = vpop.permute.xlu0 %240 }
  0x92   : > { %v243_v62 = vsub.f32 %v228_v23, %v241_v45  ;;  %v244_v6 = vsub.f32 %v229_v24, %v241_v45  ;;  %v245_v7 = vsub.f32 %v230_v25, %v241_v45  ;;  %v246_v10 = vsub.f32 %v231_v26, %v241_v45 }
  0x93   : > { %v247_v13 = vsub.f32 %v232_v29, %v241_v45  ;;  %v248_v14 = vsub.f32 %v233_v30, %v241_v45  ;;  %v249_v11 = vsub.f32 %v234_v31, %v241_v45  ;;  %v250_v16 = vsub.f32 %v235_v33, %v241_v45 }
  0x94   : > { %v251_v17 = vsub.f32 %v236_v34, %v241_v45  ;;  %v252_v18 = vsub.f32 %v237_v35, %v241_v45  ;;  %v298_v19 = vmul.f32 %v243_v62, %v243_v62  ;;  %v299_v28 = vmul.f32 %v244_v6, %v244_v6 }
  0x95   : > { %v300_v29 = vmul.f32 %v245_v7, %v245_v7  ;;  %v301_v34 = vmul.f32 %v246_v10, %v246_v10  ;;  %v302_v39 = vmul.f32 %v247_v13, %v247_v13  ;;  %v303_v40 = vmul.f32 %v248_v14, %v248_v14 }
  0x96   : > { %v305_v51 = vmul.f32 %v250_v16, %v250_v16  ;;  %v356_v62 = vperm.slane %v336_v8, 2 }
  0x99   : > { %v286_v15 = vpop.permute.xlu0 %285 }
  0x9a   : > { %v288_v20 = vsub.f32 %v273_v43, %v286_v15  ;;  %v289_v21 = vsub.f32 %v274_v44, %v286_v15  ;;  %v290_v22 = vsub.f32 %v275_v46, %v286_v15  ;;  %v291_v23 = vsub.f32 %v276_v54, %v286_v15 }
  0x9b   : > { %v292_v27 = vsub.f32 %v277_v55, %v286_v15  ;;  %v293_v24 = vsub.f32 %v278_v56, %v286_v15  ;;  %v294_v25 = vsub.f32 %v279_v57, %v286_v15  ;;  %v295_v32 = vsub.f32 %v280_v58, %v286_v15 }
  0x9c   : > { %v296_v36 = vsub.f32 %v281_v59, %v286_v15  ;;  %v308_v12 = vmul.f32 %v288_v20, %v288_v20  ;;  %v309_v26 = vmul.f32 %v289_v21, %v289_v21  ;;  %v310_v30 = vmul.f32 %v290_v22, %v290_v22 }
  0x9d   : > { %v311_v31 = vmul.f32 %v291_v23, %v291_v23  ;;  %v312_v37 = vmul.f32 %v292_v27, %v292_v27  ;;  %v297_v33 = vsub.f32 %v282_v60, %v286_v15  ;;  %v313_v35 = vmul.f32 %v293_v24, %v293_v24 }
  0x9e   : > { %v314_v38 = vmul.f32 %v294_v25, %v294_v25  ;;  %v318_v41 = vadd.f32 %v308_v12, %v298_v19  ;;  %v319_v42 = vadd.f32 %v309_v26, %v299_v28  ;;  %v304_v43 = vmul.f32 %v249_v11, %v249_v11 }
  0x9f   : > { %v315_v44 = vmul.f32 %v295_v32, %v295_v32  ;;  %v316_v45 = vmul.f32 %v296_v36, %v296_v36  ;;  %v320_v46 = vadd.f32 %v310_v30, %v300_v29  ;;  %v321_v47 = vadd.f32 %v311_v31, %v301_v34 }
  0xa0   : > { %v322_v48 = vadd.f32 %v312_v37, %v302_v39  ;;  %v358_v49 = vmul.f32 %v348_v63, %v318_v41  ;;  %v359_v50 = vmul.f32 %v349_v0, %v319_v42  ;;  %v317_v52 = vmul.f32 %v297_v33, %v297_v33 }
  0xa1   : > { %v323_v53 = vadd.f32 %v313_v35, %v303_v40  ;;  %v324_v54 = vadd.f32 %v314_v38, %v304_v43  ;;  %v306_v55 = vmul.f32 %v251_v17, %v251_v17  ;;  %v355_v56 = vperm.slane %v335_v61, 2 }
  0xa2   : > { %v418_v57 = vmul.f32 -0.0003125, %v358_v49  ;;  %v307_v58 = vmul.f32 %v252_v18, %v252_v18  ;;  %v325_v59 = vadd.f32 %v315_v44, %v305_v51  ;;  %v419_v60 = vmul.f32 -0.0003125, %v359_v50 }
  0xa3   : > { %v326_v6 = vadd.f32 %v316_v45, %v306_v55  ;;  %v360_v7 = vmul.f32 %v350_v1, %v320_v46  ;;  %v361_v10 = vmul.f32 %v351_v2, %v321_v47  ;;  %v362_v13 = vmul.f32 %v352_v3, %v322_v48 }
  0xa4   : > { %v327_v14 = vadd.f32 %v317_v52, %v307_v58  ;;  %v363_v11 = vmul.f32 %v1167_v4, %v323_v53  ;;  %v364_v63 = vmul.f32 %v1169_v5, %v324_v54  ;;  %v357_v0 = vperm.slane %v337_v9, 2 }
  0xa5   : > { %v428_v15 = vmul.f32 1.442695, %v418_v57  ;;  %v365_v16 = vmul.f32 %v355_v56, %v325_v59  ;;  %v430_v19 = vmul.f32 1.442695, %v419_v60  ;;  %v368_v17 = vmul.f32 -0.03125, %v358_v49 }
  0xa6   : > { %v369_v61 = vmul.f32 -0.03125, %v359_v50  ;;  %v366_v20 = vmul.f32 %v356_v62, %v326_v6  ;;  %v370_v18 = vmul.f32 -0.03125, %v360_v7  ;;  %v371_v21 = vmul.f32 -0.03125, %v361_v10 }
  0xa7   : > { %v372_v22 = vmul.f32 -0.03125, %v362_v13  ;;  %v420_v8 = vmul.f32 -0.0003125, %v360_v7  ;;  %v367_v23 = vmul.f32 %v357_v0, %v327_v14  ;;  %v373_v1 = vmul.f32 -0.03125, %v363_v11 }
  0xa8   : > { %v374_v2 = vmul.f32 -0.03125, %v364_v63  ;;  %v378_v3 = vmul.f32 1.442695, %v368_v17  ;;  %v380_v27 = vmul.f32 1.442695, %v369_v61  ;;  %904 = vpow2.f32 %v428_v15 }
  0xa9   : > { %v382_v24 = vmul.f32 1.442695, %v370_v18  ;;  %v421_v4 = vmul.f32 -0.0003125, %v361_v10  ;;  %v375_v5 = vmul.f32 -0.03125, %v365_v16  ;;  %906 = vpow2.f32 %v430_v19 }
  0xaa   : > { %v384_v9 = vmul.f32 1.442695, %v371_v21  ;;  %v422_v25 = vmul.f32 -0.0003125, %v362_v13  ;;  %v376_v28 = vmul.f32 -0.03125, %v366_v20  ;;  %908 = vpow2.f32 %v378_v3 }
  0xab   : > { %v386_v32 = vmul.f32 1.442695, %v372_v22  ;;  %v423_v36 = vmul.f32 -0.0003125, %v363_v11  ;;  %v377_v12 = vmul.f32 -0.03125, %v367_v23  ;;  %910 = vpow2.f32 %v380_v27 }
  0xac   : > { %v388_v26 = vmul.f32 1.442695, %v373_v1  ;;  %v424_v29 = vmul.f32 -0.0003125, %v364_v63  ;;  %v425_v30 = vmul.f32 -0.0003125, %v365_v16  ;;  %912 = vpow2.f32 %v382_v24 }
  0xad   : > { %v390_v31 = vmul.f32 1.442695, %v374_v2  ;;  %914 = vpow2.f32 %v384_v9  ;;  %v392_v37 = vmul.f32 1.442695, %v375_v5  ;;  %v426_v33 = vmul.f32 -0.0003125, %v366_v20 }
  0xae   : > { %v905_v34 = vpop.eup %904  ;;  %v1175_v35 = vmul.f32 1.442695, %v420_v8  ;;  %916 = vpow2.f32 %v386_v32  ;;  %v394_v38 = vmul.f32 1.442695, %v376_v28  ;;  %v427_v39 = vmul.f32 -0.0003125, %v367_v23 }
  0xaf   : > { %v907_v40 = vpop.eup %906  ;;  %v1177_v41 = vmul.f32 1.442695, %v421_v4  ;;  %v1179_v42 = vmul.f32 1.442695, %v422_v25  ;;  %918 = vpow2.f32 %v388_v26  ;;  %v396_v43 = vmul.f32 1.442695, %v377_v12 }
  0xb0   : > { %v909_v44 = vpop.eup %908  ;;  %v1181_v45 = vmul.f32 1.442695, %v423_v36  ;;  %v1183_v46 = vmul.f32 1.442695, %v424_v29  ;;  %v1185_v47 = vmul.f32 1.442695, %v425_v30  ;;  %920 = vpow2.f32 %v390_v31 }
  0xb1   : > { %v911_v48 = vpop.eup %910  ;;  %922 = vpow2.f32 %v392_v37  ;;  %v398_v49 = vmul.f32 255.0, %v909_v44  ;;  %v1187_v50 = vmul.f32 1.442695, %v426_v33  ;;  %v1189_v51 = vmul.f32 1.442695, %v427_v39 }
  0xb2   : > { %v913_v52 = vpop.eup %912  ;;  %924 = vpow2.f32 %v394_v38  ;;  %v399_v53 = vmul.f32 255.0, %v911_v48  ;;  %v1191_v54 = vmul.f32 39.0, %v905_v34  ;;  %v1193_v55 = vmul.f32 39.0, %v907_v40 }
  0xb3   : > { %v915_v56 = vpop.eup %914  ;;  %926 = vpow2.f32 %v396_v43  ;;  %v400_v57 = vmul.f32 255.0, %v913_v52  ;;  %vm739_vm1 = vcmp.lt.s32.totalorder %v398_v49, 0  ;;  %v740_v58 = vceil.f32 %v398_v49 }
  0xb4   : > { %v917_v59 = vpop.eup %916  ;;  %v401_v60 = vmul.f32 255.0, %v915_v56  ;;  %v741_v62 = vfloor.f32 %v398_v49  ;;  %vm744_vm2 = vcmp.lt.s32.totalorder %v399_v53, 0  ;;  %v745_v6 = vceil.f32 %v399_v53 }
  0xb5   : > { %v919_v7 = vpop.eup %918  ;;  %v402_v10 = vmul.f32 255.0, %v917_v59  ;;  %v746_v13 = vfloor.f32 %v399_v53  ;;  %vm749_vm3 = vcmp.lt.s32.totalorder %v400_v57, 0  ;;  %v750_v14 = vceil.f32 %v400_v57 }
  0xb6   : > { %v921_v11 = vpop.eup %920  ;;  %v403_v63 = vmul.f32 255.0, %v919_v7  ;;  %v742_v0 = vsel %vm739_vm1, %v740_v58, %v741_v62  ;;  %v751_v15 = vfloor.f32 %v400_v57  ;;  %vm754_vm4 = vcmp.lt.s32.totalorder %v401_v60, 0 }
  0xb7   : > { %v923_v16 = vpop.eup %922  ;;  %v404_v19 = vmul.f32 255.0, %v921_v11  ;;  %v743_v17 = vcvt.f32.s32 %v742_v0  ;;  %v747_v61 = vsel %vm744_vm2, %v745_v6, %v746_v13  ;;  %v755_v20 = vceil.f32 %v401_v60 }
  0xb8   : > { %v925_v18 = vpop.eup %924  ;;  %v405_v21 = vmul.f32 255.0, %v923_v16  ;;  %v748_v22 = vcvt.f32.s32 %v747_v61  ;;  %v752_v8 = vsel %vm749_vm3, %v750_v14, %v751_v15  ;;  %v756_v23 = vfloor.f32 %v401_v60 }
  0xb9   : > { %v927_v1 = vpop.eup %926  ;;  %v406_v2 = vmul.f32 255.0, %v925_v18  ;;  %v753_v3 = vcvt.f32.s32 %v752_v8  ;;  %vm759_vm5 = vcmp.lt.s32.totalorder %v402_v10, 0  ;;  %v760_v27 = vceil.f32 %v402_v10 }
  0xba   : > { %v407_v24 = vmul.f32 255.0, %v927_v1  ;;  %v757_v4 = vsel %vm754_vm4, %v755_v20, %v756_v23  ;;  %v761_v5 = vfloor.f32 %v402_v10  ;;  %vm764_vm6 = vcmp.lt.s32.totalorder %v403_v63, 0 }
  0xbb   : > { %v758_v9 = vcvt.f32.s32 %v757_v4  ;;  %v765_v25 = vceil.f32 %v403_v63  ;;  %v766_v28 = vfloor.f32 %v403_v63  ;;  %vm769_vm7 = vcmp.lt.s32.totalorder %v404_v19, 0 }
  0xbc   : > { %v762_v32 = vsel %vm759_vm5, %v760_v27, %v761_v5  ;;  %v770_v36 = vceil.f32 %v404_v19  ;;  %v771_v12 = vfloor.f32 %v404_v19  ;;  %vm774_vm8 = vcmp.lt.s32.totalorder %v405_v21, 0 }
  0xbd   : > { %v763_v26 = vcvt.f32.s32 %v762_v32  ;;  %v767_v29 = vsel %vm764_vm6, %v765_v25, %v766_v28  ;;  %v775_v30 = vceil.f32 %v405_v21  ;;  %v776_v31 = vfloor.f32 %v405_v21 }
  0xbe   : > { %v768_v37 = vcvt.f32.s32 %v767_v29  ;;  %v772_v33 = vsel %vm769_vm7, %v770_v36, %v771_v12  ;;  %vm779_vm11 = vcmp.lt.s32.totalorder %v406_v2, 0  ;;  %v780_v34 = vceil.f32 %v406_v2  ;;  %v1230_v29 = vpop.permute.xlu1 %470 }
  0xbf   : > { %v773_v38 = vcvt.f32.s32 %v772_v33  ;;  %v777_v39 = vsel %vm774_vm8, %v775_v30, %v776_v31  ;;  %v781_v40 = vfloor.f32 %v406_v2  ;;  %vm784_vm13 = vcmp.lt.s32.totalorder %v407_v24, 0 }
  0xc0   : > { %v778_v43 = vcvt.f32.s32 %v777_v39  ;;  %v785_v44 = vceil.f32 %v407_v24  ;;  %v786_v48 = vfloor.f32 %v407_v24  ;;  %v482_v49 = vpack.c.b16 %v743_v17, %v743_v17 }
  0xc1   : > { %v782_v52 = vsel %vm779_vm11, %v780_v34, %v781_v40  ;;  %v484_v53 = vpack.c.b16 %v748_v22, %v748_v22  ;;  %v486_v56 = vpack.c.b16 %v753_v3, %v753_v3  ;;  %v488_v57 = vpack.c.b16 %v758_v9, %v758_v9 }
  0xc2   : > { %vm530_vm1 = vcmask 1043456   ;;  %v783_v58 = vcvt.f32.s32 %v782_v52  ;;  %v787_v59 = vsel %vm784_vm13, %v785_v44, %v786_v48  ;;  %v483_v60 = vpack.c.b8 %v482_v49, %v482_v49 }
  0xc3   : > { %v490_v62 = vpack.c.b16 %v763_v26, %v763_v26  ;;  %v788_v6 = vcvt.f32.s32 %v787_v59  ;;  %v485_v7 = vpack.c.b8 %v484_v53, %v484_v53  ;;  %v487_v10 = vpack.c.b8 %v486_v56, %v486_v56 }
  0xc4   : > { %v489_v13 = vpack.c.b8 %v488_v57, %v488_v57  ;;  %v492_v11 = vpack.c.b16 %v768_v37, %v768_v37  ;;  %v494_v63 = vpack.c.b16 %v773_v38, %v773_v38  ;;  %v496_v0 = vpack.c.b16 %v778_v43, %v778_v43 }
  0xc5   : > { %v491_v14 = vpack.c.b8 %v490_v62, %v490_v62  ;;  %v498_v15 = vpack.c.b16 %v783_v58, %v783_v58  ;;  %v500_v16 = vpack.c.b16 %v788_v6, %v788_v6  ;;  %v502_v19 = vrot.slane %v485_v7, 7 }
  0xc6   : > { %v503_v17 = vrot.slane %v487_v10, 6  ;;  %v493_v61 = vpack.c.b8 %v492_v11, %v492_v11  ;;  %v495_v20 = vpack.c.b8 %v494_v63, %v494_v63  ;;  %v497_v18 = vpack.c.b8 %v496_v0, %v496_v0 }
  0xc7   : > { %v504_v21 = vrot.slane %v489_v13, 5  ;;  %v499_v22 = vpack.c.b8 %v498_v15, %v498_v15  ;;  %v501_v8 = vpack.c.b8 %v500_v16, %v500_v16  ;;  %v505_v23 = vrot.slane %v491_v14, 4 }
  0xc8   : > { %v513_v1 = vsel %vm510_vm9, %v483_v60, %v502_v19  ;;  %v506_v2 = vrot.slane %v493_v61, 3  ;;  %v507_v3 = vrot.slane %v495_v20, 2  ;;  %v508_v27 = vrot.slane %v497_v18, 1 }
  0xc9   : > { %v517_v24 = vsel %vm514_vm10, %v503_v17, %v504_v21  ;;  %v509_v4 = vrot.slane %v501_v8, 7  ;;  %928 = vpow2.f32 %v1175_v35  ;;  %vm789_vm2 = vcmp.lt.s32.totalorder %v1191_v54, 0 }
  0xca   : > { %v519_v5 = vsel %vm518_vm12, %v513_v1, %v517_v24  ;;  %v523_v9 = vsel %vm520_vm14, %v505_v23, %v506_v2  ;;  %v527_v25 = vsel %vm524_vm15, %v507_v3, %v508_v27  ;;  %930 = vpow2.f32 %v1177_v41 }
  0xcb   : > { %v790_v28 = vceil.f32 %v1191_v54  ;;  %v529_v32 = vsel %vm528_vm0, %v523_v9, %v527_v25  ;;  %v535_v36 = vsel %vm510_vm9, %v499_v22, %v509_v4  ;;  %932 = vpow2.f32 %v1179_v42 }
  0xcc   : > { %v791_v35 = vfloor.f32 %v1191_v54  ;;  %v531_v12 = vsel %vm530_vm1, %v519_v5, %v529_v32  ;;  %538 = vst [vmem:[%s182_s19 + $0x8] sm:$0x3] %v535_v36  ;;  %934 = vpow2.f32 %v1181_v45  ;;  %vm794_vm3 = vcmp.lt.s32.totalorder %v1193_v55, 0 }
  0xcd   : > { %v795_v41 = vceil.f32 %v1193_v55  ;;  %537 = vst [vmem:[%s182_s19] sm:$0xff] %v531_v12  ;;  %936 = vpow2.f32 %v1183_v46  ;;  %v796_v42 = vfloor.f32 %v1193_v55 }
  0xce   : > { %v792_v26 = vsel %vm789_vm2, %v790_v28, %v791_v35 }
  0xcf   : > { %1001 = shalt.err (!%p998_p8)
}
  0xd0   : > { %850 = dma.vmem_to_hbm [thread:$0]  (%p1134_p5), %s608_s20, 160, %s610_s24, %s590_s25   ;;  %938 = vpow2.f32 %v1185_v47  ;;  %v793_v45 = vcvt.f32.s32 %v792_v26  ;;  %v929_v46 = vpop.eup %928  ;;  %v797_v54 = vsel %vm794_vm3, %v795_v41, %v796_v42 }
  0xd1   : > { %940 = vpow2.f32 %v1187_v50  ;;  %v931_v30 = vpop.eup %930  ;;  %v450_v31 = vmul.f32 39.0, %v929_v46  ;;  %v798_v34 = vcvt.f32.s32 %v797_v54  ;;  %s619_s11 = scalar_lea.hbm %s1304_s3, %s844_s8  ;;  %s189_s16 = scalar_lea.vmem [#allocation6], %s737_s9 }
  0xd2   : > { %942 = vpow2.f32 %v1189_v51  ;;  %v933_v37 = vpop.eup %932  ;;  %v451_v33 = vmul.f32 39.0, %v931_v30  ;;  %v472_v38 = vadd.s32 %v793_v45, %v1230_v29  ;;  %s621_s17 = sshll.u32 %s189_s16, 4  ;;  %s623_s19 = sshll.u32 %s619_s11, 4  ;;  %s622_s17 = int_to_ptr.vmem [resolvable:$true] %s621_s17  ;;  %s624_s19 = int_to_ptr.hbm [resolvable:$true] %s623_s19 }
  0xd3   : > { %v935_v39 = vpop.eup %934  ;;  %v452_v40 = vmul.f32 39.0, %v933_v37  ;;  %vm799_vm4 = vcmp.lt.s32.totalorder %v450_v31, 0  ;;  %v800_v47 = vceil.f32 %v450_v31  ;;  %v801_v43 = vfloor.f32 %v450_v31  ;;  %s595_s8 = scalar_lea.sflag [#allocation7], %s1197_s7  ;;  %s1016_s20 = sshra.s32 %s624_s19, 4  ;;  %s1017_s20 = int_to_ptr.hbm [resolvable:$true] %s1016_s20 }
  0xd4   : > { %v937_v44 = vpop.eup %936  ;;  %v453_v48 = vmul.f32 39.0, %v935_v39  ;;  %vm804_vm5 = vcmp.lt.s32.totalorder %v451_v33, 0  ;;  %v805_v50 = vceil.f32 %v451_v33  ;;  %v806_v55 = vfloor.f32 %v451_v33  ;;  %s1018_s9 = scalar_lea.hbm %s1017_s20, 10  ;;  %s1022_s26 = scalar_lea.hbm %s1304_s3, 20 }
  0xd5   : > { %v454_v52 = vmul.f32 39.0, %v937_v44  ;;  %v802_v53 = vsel %vm799_vm4, %v800_v47, %v801_v43  ;;  %vm809_vm6 = vcmp.lt.s32.totalorder %v452_v40, 0  ;;  %v810_v51 = vceil.f32 %v452_v40  ;;  %p1019_p9 = scmp.ne.s32.totalorder %s1017_s20, %s1018_s9  ;;  %p1023_p12 = scmp.lt.s32.totalorder %s1017_s20, %s1304_s3 }
  0xd6   : > { %v939_v49 = vpop.eup %938  ;;  %v803_v58 = vcvt.f32.s32 %v802_v53  ;;  %v807_v59 = vsel %vm804_vm5, %v805_v50, %v806_v55  ;;  %v811_v60 = vfloor.f32 %v452_v40  ;;  %vm814_vm7 = vcmp.lt.s32.totalorder %v453_v48, 0  ;;  %p1024_p13 = scmp.lt.s32.totalorder %s1022_s26, %s1018_s9 }
  0xd7   : > { %v941_v56 = vpop.eup %940  ;;  %v455_v57 = vmul.f32 39.0, %v939_v49  ;;  %v808_v7 = vcvt.f32.s32 %v807_v59  ;;  %v815_v10 = vceil.f32 %v453_v48  ;;  %v816_v11 = vfloor.f32 %v453_v48  ;;  %p1020_p10 = pnand %p1019_p9, %p1134_p5 }
  0xd8   : > { %v943_v62 = vpop.eup %942  ;;  %v456_v6 = vmul.f32 39.0, %v941_v56  ;;  %v812_v14 = vsel %vm809_vm6, %v810_v51, %v811_v60  ;;  %vm819_vm8 = vcmp.lt.s32.totalorder %v454_v52, 0  ;;  %v820_v0 = vceil.f32 %v454_v52  ;;  %p1025_p0 = por %p1024_p13, %p1023_p12 }
  0xd9   : > { %v457_v13 = vmul.f32 39.0, %v943_v62  ;;  %v813_v63 = vcvt.f32.s32 %v812_v14  ;;  %v821_v15 = vfloor.f32 %v454_v52  ;;  %vm824_vm11 = vcmp.lt.s32.totalorder %v455_v57, 0  ;;  %p1021_p11 = pneg %p1020_p10 }
  0xda   : > { %v817_v16 = vsel %vm814_vm7, %v815_v10, %v816_v11  ;;  %v825_v19 = vceil.f32 %v455_v57  ;;  %v826_v17 = vfloor.f32 %v455_v57  ;;  %vm829_vm13 = vcmp.lt.s32.totalorder %v456_v6, 0 }
  0xdb   : > { %v818_v61 = vcvt.f32.s32 %v817_v16  ;;  %v822_v20 = vsel %vm819_vm8, %v820_v0, %v821_v15  ;;  %v830_v18 = vceil.f32 %v456_v6  ;;  %v831_v21 = vfloor.f32 %v456_v6  ;;  %p1026_p1 = pnand %p1025_p0, %p1021_p11 }
  0xdc   : > { %v823_v22 = vcvt.f32.s32 %v822_v20  ;;  %v827_v8 = vsel %vm824_vm11, %v825_v19, %v826_v17  ;;  %vm834_vm2 = vcmp.lt.s32.totalorder %v457_v13, 0  ;;  %v835_v23 = vceil.f32 %v457_v13 }
  0xdd   : > { %v828_v1 = vcvt.f32.s32 %v827_v8  ;;  %v832_v2 = vsel %vm829_vm13, %v830_v18, %v831_v21  ;;  %v836_v3 = vfloor.f32 %v457_v13  ;;  %v473_v27 = vadd.s32 %v798_v34, %v1230_v29 }
  0xde   : > { %v833_v24 = vcvt.f32.s32 %v832_v2  ;;  %v474_v4 = vadd.s32 %v803_v58, %v1230_v29  ;;  %v475_v5 = vadd.s32 %v808_v7, %v1230_v29  ;;  %v476_v9 = vadd.s32 %v813_v63, %v1230_v29 }
  0xdf   : > { %v837_v25 = vsel %vm834_vm2, %v835_v23, %v836_v3  ;;  %v477_v28 = vadd.s32 %v818_v61, %v1230_v29  ;;  %v478_v32 = vadd.s32 %v823_v22, %v1230_v29  ;;  %v479_v36 = vadd.s32 %v828_v1, %v1230_v29 }
  0xe0   : > { %v838_v35 = vcvt.f32.s32 %v837_v25  ;;  %v480_v12 = vadd.s32 %v833_v24, %v1230_v29  ;;  %v539_v41 = vpack.c.b16 %v472_v38, %v472_v38  ;;  %v541_v26 = vpack.c.b16 %v473_v27, %v473_v27 }
  0xe1   : > { %v543_v42 = vpack.c.b16 %v474_v4, %v474_v4  ;;  %v545_v45 = vpack.c.b16 %v475_v5, %v475_v5  ;;  %v547_v46 = vpack.c.b16 %v476_v9, %v476_v9  ;;  %v549_v54 = vpack.c.b16 %v477_v28, %v477_v28 }
  0xe2   : > { %v481_v30 = vadd.s32 %v838_v35, %v1230_v29  ;;  %v540_v31 = vpack.c.b8 %v539_v41, %v539_v41  ;;  %v542_v37 = vpack.c.b8 %v541_v26, %v541_v26  ;;  %v551_v33 = vpack.c.b16 %v478_v32, %v478_v32 }
  0xe3   : > { %v544_v34 = vpack.c.b8 %v543_v42, %v543_v42  ;;  %v546_v39 = vpack.c.b8 %v545_v45, %v545_v45  ;;  %v548_v40 = vpack.c.b8 %v547_v46, %v547_v46  ;;  %v550_v47 = vpack.c.b8 %v549_v54, %v549_v54 }
  0xe4   : > { %v552_v43 = vpack.c.b8 %v551_v33, %v551_v33  ;;  %v553_v44 = vpack.c.b16 %v479_v36, %v479_v36  ;;  %v555_v48 = vpack.c.b16 %v480_v12, %v480_v12  ;;  %v557_v50 = vpack.c.b16 %v481_v30, %v481_v30 }
  0xe5   : > { %v559_v38 = vrot.slane %v542_v37, 7  ;;  %v560_v55 = vrot.slane %v544_v34, 6  ;;  %v561_v49 = vrot.slane %v546_v39, 5  ;;  %v562_v52 = vrot.slane %v548_v40, 4 }
  0xe6   : > { %v554_v29 = vpack.c.b8 %v553_v44, %v553_v44  ;;  %v558_v53 = vpack.c.b8 %v557_v50, %v557_v50  ;;  %v563_v51 = vrot.slane %v550_v47, 3  ;;  %v564_v56 = vrot.slane %v552_v43, 2 }
  0xe7   : > { %v569_v57 = vsel %vm510_vm9, %v540_v31, %v559_v38  ;;  %v572_v58 = vsel %vm514_vm10, %v560_v55, %v561_v49  ;;  %v556_v59 = vpack.c.b8 %v555_v48, %v555_v48 }
  0xe8   : > { %v565_v60 = vrot.slane %v554_v29, 1  ;;  %v566_v62 = vrot.slane %v558_v53, 7  ;;  %v576_v6 = vsel %vm520_vm14, %v562_v52, %v563_v51  ;;  %v573_v7 = vsel %vm518_vm12, %v569_v57, %v572_v58 }
  0xea   : > { %v579_v10 = vsel %vm524_vm15, %v564_v56, %v565_v60  ;;  %v585_v13 = vsel %vm510_vm9, %v556_v59, %v566_v62 }
  0xeb   : > { %v580_v14 = vsel %vm528_vm0, %v576_v6, %v579_v10  ;;  %588 = vst [vmem:[%s189_s16 + $0x8] sm:$0x3] %v585_v13 }
  0xec   : > { %v581_v11 = vsel %vm530_vm1, %v573_v7, %v580_v14 }
  0xed   : > { %587 = vst [vmem:[%s189_s16] sm:$0xff] %v581_v11 }
  0xee   : > { %1029 = shalt.err (!%p1026_p1)
}
  0xef   : > { %851 = dma.vmem_to_hbm [thread:$0]  (%p1134_p5), %s622_s17, 160, %s624_s19, %s595_s8  }
  0xf0 PF: > { %p867_p2 = scmp.ge.s32.totalorder %s1072_s15, 2  ;;  %s635_s7 = sand.u32 1, %s1060_s12  }
  0xf1   : > { %s636_s29 = scalar_lea.sflag [#allocation4], %s635_s7 }
  0xf2   : > { %p859_p3 = pnand %p867_p2, %p1138_p6 }
  0xf4   : > { %p860_p4 = pneg %p859_p3 }
  0xf6   : > { %1051 = dma.done.wait (%p860_p4), %s636_s29, 160  }
  0xf7   : > { %1053 = vsyncadd (%p860_p4), %s636_s29, 4294967136  ;;  %s646_s30 = scalar_lea.sflag [#allocation7], %s635_s7 }
  0xf8   : > { %1055 = dma.done.wait (%p860_p4), %s646_s30, 160  }
  0xf9   : > { %1057 = vsyncadd (%p860_p4), %s646_s30, 4294967136  ;;  %p18_p5 = scmp.ge.s32.totalorder %s1121_s18, 4   ;;  %s1307_s12 = smov %s1064_s13 }
  0xfa   : > { %s1308_s13 = smov %s1068_s14  ;;  %s1309_s14 = smov %s1132_s21 }
  0xfb   : > { %s1310_s15 = smov %s1121_s18  ;;  %20 = sbr.rel (!%p18_p5) target bundleno = 6 (0x6), region = 85 }
 0x100   :  { %652 = vsyncpa [#allocation3], 1 }
 0x101   :  { %654 = vsyncpa [#allocation3 + $0x1], 1 }
 0x102   :  { %655 = vsyncpa [#allocation4], 1 }
 0x103   :  { %657 = vsyncpa [#allocation4 + $0x1], 1 }
 0x104   :  { %658 = vsyncpa [#allocation7], 1 }
 0x105   :  { %660 = vsyncpa [#allocation7 + $0x1], 1 }

</bundles_post_ra>
